<compile_context>
chip_gen: v7x
topology: tpu7x:2x2x1
jax: 0.10.0
libtpu: 0.0.40
codegen_flags: <defaults>
</compile_context>

<pallas_src>
import jax
import jax.numpy as jnp
from jax.experimental import pallas as pl
from jax.experimental.pallas import tpu as pltpu

KERNEL_SIZES = (3, 5, 9)
MAX_PAD = max(KERNEL_SIZES) // 2      # 4
N_TAPS = 2 * MAX_PAD + 1              # 9
HALO = 128                            # lane-block used for the halo read
BN_EPS = 1e-5


def _round_up(x, m):
    return (x + m - 1) // m * m


def _msconv_kernel(xc_ref, xn_ref, w_ref, b_ref, o_ref):
    """One (batch, L-tile) grid step.

    xc_ref: (1, C_in, TL)    bf16 padded-input tile (sequence on lanes)
    xn_ref: (1, C_in, 128)   bf16 halo: first 128 lanes of the next tile
    w_ref : (9, C3, C_in)    bf16 tap-major merged weights (BN scale folded)
    b_ref : (C3, 1)          f32 folded conv-bias + BN shift
    o_ref : (1, C3, TL)      output tile (channels on sublanes, seq on lanes)
    """
    n_taps, c3, _ = w_ref.shape
    cur = xc_ref[0].astype(jnp.float32)          # (C_in, TL)
    nxt = xn_ref[0].astype(jnp.float32)          # (C_in, 128)
    tl = cur.shape[-1]

    acc = jnp.zeros((c3, tl), jnp.float32)
    for t in range(n_taps):                      # static unroll, 9 taps
        if t == 0:
            win = cur
        else:
            # window shifted left by t lanes; tail comes from the halo block
            win = jnp.concatenate([cur[:, t:], nxt[:, :t]], axis=1)
        acc = acc + jnp.dot(w_ref[t], win.astype(jnp.bfloat16),
                            preferred_element_type=jnp.float32)

    y = acc + b_ref[...]                         # f32 epilogue (lane broadcast)
    o_ref[0] = jnp.maximum(y, 0.0).astype(o_ref.dtype)


@jax.jit
def multi_scale_conv_embedding(x, w_list, b_list, bn_params):
    """x: (B, L, C_in) f32 -> (B, L, 3*C_out) f32 (BatchNorm in eval mode)."""
    B, L, c_in = x.shape
    c_out = w_list[0].shape[0]
    c3 = len(KERNEL_SIZES) * c_out

    # ---- fold conv bias + BN (running stats); merge paths tap-major ---------
    w9 = jnp.zeros((N_TAPS, c3, c_in), jnp.float32)
    biases = []
    row = 0
    for k, w, b, (gamma, beta, mean, var) in zip(
            KERNEL_SIZES, w_list, b_list, bn_params):
        s = gamma / jnp.sqrt(var + BN_EPS)                   # (C_out,)
        biases.append(beta + (b - mean) * s)
        ws = w * s[:, None, None]                            # fold BN scale
        off = MAX_PAD - k // 2                               # tap alignment
        # (C_out, C_in, k) -> (k, C_out, C_in), placed at taps [off, off+k)
        w9 = w9.at[off:off + k, row:row + c_out, :].set(
            jnp.transpose(ws, (2, 0, 1)))
        row += c_out
    w9 = w9.astype(jnp.bfloat16)                                      # (9, C3, C_in)
    bias = jnp.concatenate(biases).reshape(c3, 1).astype(jnp.float32)  # (C3, 1)

    # ---- padded NCL input; halo handled via a 128-lane block of the next tile
    TL = min(1024, _round_up(L, 128))            # lane tile (multiple of 128)
    Lp = _round_up(L, TL)
    n_l = Lp // TL
    Lpad = Lp + HALO                             # room for the last halo block

    xt = jnp.transpose(x, (0, 2, 1)).astype(jnp.bfloat16)             # (B,C_in,L)
    x_pad = jnp.pad(xt, ((0, 0), (0, 0), (MAX_PAD, Lpad - L - MAX_PAD)))

    halo_blocks = TL // HALO                     # halo spec indexes 128-lane blocks

    out = pl.pallas_call(
        _msconv_kernel,
        out_shape=jax.ShapeDtypeStruct((B, c3, Lp), x.dtype),
        grid=(B, n_l),
        in_specs=[
            pl.BlockSpec((1, c_in, TL), lambda bi, j: (bi, 0, j)),
            pl.BlockSpec((1, c_in, HALO),
                         lambda bi, j: (bi, 0, (j + 1) * halo_blocks)),
            pl.BlockSpec((N_TAPS, c3, c_in), lambda bi, j: (0, 0, 0)),
            pl.BlockSpec((c3, 1), lambda bi, j: (0, 0)),
        ],
        out_specs=pl.BlockSpec((1, c3, TL), lambda bi, j: (bi, 0, j)),
        compiler_params=pltpu.CompilerParams(
            dimension_semantics=("parallel", "parallel")),
    )(x_pad, x_pad, w9, bias)

    # back to channels-last, drop sequence padding (mirrors the module's permute)
    return jnp.transpose(out[:, :, :L], (0, 2, 1))


def reference_forward(x, w_list, b_list, bn_params):
    """Pure-JAX reference mirroring the PyTorch forward (BN in eval mode)."""
    xt = jnp.transpose(x, (0, 2, 1))            # (B, C_in, L)
    outs = []
    for k, w, b, (gamma, beta, mean, var) in zip(
            KERNEL_SIZES, w_list, b_list, bn_params):
        y = jax.lax.conv_general_dilated(
            xt, w, window_strides=(1,), padding=[(k // 2, k // 2)],
            dimension_numbers=("NCH", "OIH", "NCH"))
        y = y + b[None, :, None]
        y = (y - mean[None, :, None]) / jnp.sqrt(var[None, :, None] + BN_EPS)
        y = y * gamma[None, :, None] + beta[None, :, None]
        y = jnp.maximum(y, 0.0)
        outs.append(y)
    out = jnp.concatenate(outs, axis=1)
    return jnp.transpose(out, (0, 2, 1))


if __name__ == "__main__":
    # Small shapes consistent with the module: x is (B, seq, in_channels).
    B, L, C_IN, C_OUT = 2, 16, 4, 8

    key = jax.random.PRNGKey(0)
    keys = jax.random.split(key, 1 + 4 * len(KERNEL_SIZES))
    x = jax.random.normal(keys[0], (B, L, C_IN), dtype=jnp.float32)

    w_list, b_list, bn_params = [], [], []
    for i, k in enumerate(KERNEL_SIZES):
        kw, kb, kg, kv = keys[1 + 4 * i: 1 + 4 * (i + 1)]
        # Conv1d weight (C_out, C_in, k) and bias (C_out,), deterministic init.
        w_list.append(0.1 * jax.random.normal(kw, (C_OUT, C_IN, k), jnp.float32))
        b_list.append(0.1 * jax.random.normal(kb, (C_OUT,), jnp.float32))
        gamma = 1.0 + 0.1 * jax.random.normal(kg, (C_OUT,), jnp.float32)
        beta = 0.1 * jax.random.normal(kv, (C_OUT,), jnp.float32)
        running_mean = 0.05 * jax.random.normal(kg, (C_OUT,), jnp.float32)
        running_var = jnp.abs(1.0 + 0.1 * jax.random.normal(kv, (C_OUT,), jnp.float32))
        # TODO(synk): training-mode BatchNorm (per-batch statistics) not implemented;
        # eval-mode running statistics are used instead.
        bn_params.append((gamma, beta, running_mean, running_var))

    out = multi_scale_conv_embedding(x, w_list, b_list, bn_params)
    out = jax.block_until_ready(out)

    ref = reference_forward(x, w_list, b_list, bn_params)
    assert out.shape == (B, L, 3 * C_OUT), out.shape
    # bf16 matmul operands with f32 accumulation -> relaxed tolerance.
    assert jnp.allclose(out, ref, atol=3e-2, rtol=3e-2), float(
        jnp.max(jnp.abs(out - ref)))

    print("KERNEL_OK")
</pallas_src>

<mosaic_0001>
module attributes {stable_mosaic.version = 11 : i64} {
  func.func @_msconv_kernel(%arg0: i32, %arg1: i32, %arg2: memref<1x4x128xbf16, #tpu.memory_space<vmem>>, %arg3: memref<1x4x128xbf16, #tpu.memory_space<vmem>>, %arg4: memref<9x24x4xbf16, #tpu.memory_space<vmem>>, %arg5: memref<24x1xf32, #tpu.memory_space<vmem>>, %arg6: memref<1x24x128xf32, #tpu.memory_space<vmem>>) attributes {dimension_semantics = [#tpu.dimension_semantics<parallel>, #tpu.dimension_semantics<parallel>], iteration_bounds = array<i64: 2, 1>, scalar_prefetch = 0 : i64, scratch_operands = 0 : i64, tpu.core_type = #tpu.core_type<tc>, window_params = [{transform_indices = @transform_0, window_bounds = array<i64: 1, 4, 128>}, {transform_indices = @transform_1, window_bounds = array<i64: 1, 4, 128>}, {pipeline_mode = #tpu.pipeline_mode<synchronous>, transform_indices = @transform_2, window_bounds = array<i64: 9, 24, 4>}, {pipeline_mode = #tpu.pipeline_mode<synchronous>, transform_indices = @transform_3, window_bounds = array<i64: 24, 1>}, {transform_indices = @transform_4, window_bounds = array<i64: 1, 24, 128>}]} {
    %c0 = arith.constant 0 : index
    %c0_0 = arith.constant 0 : index
    %c0_1 = arith.constant 0 : index
    %0 = vector.load %arg2[%c0, %c0_0, %c0_1] : memref<1x4x128xbf16, #tpu.memory_space<vmem>>, vector<1x4x128xbf16>
    %1 = vector.shape_cast %0 : vector<1x4x128xbf16> to vector<4x128xbf16>
    %2 = arith.extf %1 : vector<4x128xbf16> to vector<4x128xf32>
    %c0_2 = arith.constant 0 : index
    %c0_3 = arith.constant 0 : index
    %c0_4 = arith.constant 0 : index
    %3 = vector.load %arg3[%c0_2, %c0_3, %c0_4] : memref<1x4x128xbf16, #tpu.memory_space<vmem>>, vector<1x4x128xbf16>
    %4 = vector.shape_cast %3 : vector<1x4x128xbf16> to vector<4x128xbf16>
    %5 = arith.extf %4 : vector<4x128xbf16> to vector<4x128xf32>
    %cst = arith.constant 0.000000e+00 : f32
    %6 = vector.broadcast %cst : f32 to vector<24x128xf32>
    %c0_5 = arith.constant 0 : index
    %c0_6 = arith.constant 0 : index
    %c0_7 = arith.constant 0 : index
    %7 = vector.load %arg4[%c0_5, %c0_6, %c0_7] : memref<9x24x4xbf16, #tpu.memory_space<vmem>>, vector<1x24x4xbf16>
    %8 = vector.shape_cast %7 : vector<1x24x4xbf16> to vector<24x4xbf16>
    %9 = arith.truncf %2 : vector<4x128xf32> to vector<4x128xbf16>
    %cst_8 = arith.constant dense<0.000000e+00> : vector<24x128xf32>
    %10 = tpu.matmul %8, %9, %cst_8 {dimension_numbers = #tpu.dot_dimension_numbers<[1], [0], [0], [1], [0, 0, 1, 1], [], []>} : vector<24x4xbf16>, vector<4x128xbf16>, vector<24x128xf32> -> vector<24x128xf32>
    %11 = arith.addf %6, %10 : vector<24x128xf32>
    %12 = vector.extract_strided_slice %2 {offsets = [0, 1], sizes = [4, 127], strides = [1, 1]} : vector<4x128xf32> to vector<4x127xf32>
    %13 = vector.extract_strided_slice %5 {offsets = [0, 0], sizes = [4, 1], strides = [1, 1]} : vector<4x128xf32> to vector<4x1xf32>
    %14 = tpu.concatenate %12, %13 in 1 : vector<4x127xf32>, vector<4x1xf32> -> vector<4x128xf32>
    %c1 = arith.constant 1 : index
    %c0_9 = arith.constant 0 : index
    %c0_10 = arith.constant 0 : index
    %15 = vector.load %arg4[%c1, %c0_9, %c0_10] : memref<9x24x4xbf16, #tpu.memory_space<vmem>>, vector<1x24x4xbf16>
    %16 = vector.shape_cast %15 : vector<1x24x4xbf16> to vector<24x4xbf16>
    %17 = arith.truncf %14 : vector<4x128xf32> to vector<4x128xbf16>
    %cst_11 = arith.constant dense<0.000000e+00> : vector<24x128xf32>
    %18 = tpu.matmul %16, %17, %cst_11 {dimension_numbers = #tpu.dot_dimension_numbers<[1], [0], [0], [1], [0, 0, 1, 1], [], []>} : vector<24x4xbf16>, vector<4x128xbf16>, vector<24x128xf32> -> vector<24x128xf32>
    %19 = arith.addf %11, %18 : vector<24x128xf32>
    %20 = vector.extract_strided_slice %2 {offsets = [0, 2], sizes = [4, 126], strides = [1, 1]} : vector<4x128xf32> to vector<4x126xf32>
    %21 = vector.extract_strided_slice %5 {offsets = [0, 0], sizes = [4, 2], strides = [1, 1]} : vector<4x128xf32> to vector<4x2xf32>
    %22 = tpu.concatenate %20, %21 in 1 : vector<4x126xf32>, vector<4x2xf32> -> vector<4x128xf32>
    %c2 = arith.constant 2 : index
    %c0_12 = arith.constant 0 : index
    %c0_13 = arith.constant 0 : index
    %23 = vector.load %arg4[%c2, %c0_12, %c0_13] : memref<9x24x4xbf16, #tpu.memory_space<vmem>>, vector<1x24x4xbf16>
    %24 = vector.shape_cast %23 : vector<1x24x4xbf16> to vector<24x4xbf16>
    %25 = arith.truncf %22 : vector<4x128xf32> to vector<4x128xbf16>
    %cst_14 = arith.constant dense<0.000000e+00> : vector<24x128xf32>
    %26 = tpu.matmul %24, %25, %cst_14 {dimension_numbers = #tpu.dot_dimension_numbers<[1], [0], [0], [1], [0, 0, 1, 1], [], []>} : vector<24x4xbf16>, vector<4x128xbf16>, vector<24x128xf32> -> vector<24x128xf32>
    %27 = arith.addf %19, %26 : vector<24x128xf32>
    %28 = vector.extract_strided_slice %2 {offsets = [0, 3], sizes = [4, 125], strides = [1, 1]} : vector<4x128xf32> to vector<4x125xf32>
    %29 = vector.extract_strided_slice %5 {offsets = [0, 0], sizes = [4, 3], strides = [1, 1]} : vector<4x128xf32> to vector<4x3xf32>
    %30 = tpu.concatenate %28, %29 in 1 : vector<4x125xf32>, vector<4x3xf32> -> vector<4x128xf32>
    %c3 = arith.constant 3 : index
    %c0_15 = arith.constant 0 : index
    %c0_16 = arith.constant 0 : index
    %31 = vector.load %arg4[%c3, %c0_15, %c0_16] : memref<9x24x4xbf16, #tpu.memory_space<vmem>>, vector<1x24x4xbf16>
    %32 = vector.shape_cast %31 : vector<1x24x4xbf16> to vector<24x4xbf16>
    %33 = arith.truncf %30 : vector<4x128xf32> to vector<4x128xbf16>
    %cst_17 = arith.constant dense<0.000000e+00> : vector<24x128xf32>
    %34 = tpu.matmul %32, %33, %cst_17 {dimension_numbers = #tpu.dot_dimension_numbers<[1], [0], [0], [1], [0, 0, 1, 1], [], []>} : vector<24x4xbf16>, vector<4x128xbf16>, vector<24x128xf32> -> vector<24x128xf32>
    %35 = arith.addf %27, %34 : vector<24x128xf32>
    %36 = vector.extract_strided_slice %2 {offsets = [0, 4], sizes = [4, 124], strides = [1, 1]} : vector<4x128xf32> to vector<4x124xf32>
    %37 = vector.extract_strided_slice %5 {offsets = [0, 0], sizes = [4, 4], strides = [1, 1]} : vector<4x128xf32> to vector<4x4xf32>
    %38 = tpu.concatenate %36, %37 in 1 : vector<4x124xf32>, vector<4x4xf32> -> vector<4x128xf32>
    %c4 = arith.constant 4 : index
    %c0_18 = arith.constant 0 : index
    %c0_19 = arith.constant 0 : index
    %39 = vector.load %arg4[%c4, %c0_18, %c0_19] : memref<9x24x4xbf16, #tpu.memory_space<vmem>>, vector<1x24x4xbf16>
    %40 = vector.shape_cast %39 : vector<1x24x4xbf16> to vector<24x4xbf16>
    %41 = arith.truncf %38 : vector<4x128xf32> to vector<4x128xbf16>
    %cst_20 = arith.constant dense<0.000000e+00> : vector<24x128xf32>
    %42 = tpu.matmul %40, %41, %cst_20 {dimension_numbers = #tpu.dot_dimension_numbers<[1], [0], [0], [1], [0, 0, 1, 1], [], []>} : vector<24x4xbf16>, vector<4x128xbf16>, vector<24x128xf32> -> vector<24x128xf32>
    %43 = arith.addf %35, %42 : vector<24x128xf32>
    %44 = vector.extract_strided_slice %2 {offsets = [0, 5], sizes = [4, 123], strides = [1, 1]} : vector<4x128xf32> to vector<4x123xf32>
    %45 = vector.extract_strided_slice %5 {offsets = [0, 0], sizes = [4, 5], strides = [1, 1]} : vector<4x128xf32> to vector<4x5xf32>
    %46 = tpu.concatenate %44, %45 in 1 : vector<4x123xf32>, vector<4x5xf32> -> vector<4x128xf32>
    %c5 = arith.constant 5 : index
    %c0_21 = arith.constant 0 : index
    %c0_22 = arith.constant 0 : index
    %47 = vector.load %arg4[%c5, %c0_21, %c0_22] : memref<9x24x4xbf16, #tpu.memory_space<vmem>>, vector<1x24x4xbf16>
    %48 = vector.shape_cast %47 : vector<1x24x4xbf16> to vector<24x4xbf16>
    %49 = arith.truncf %46 : vector<4x128xf32> to vector<4x128xbf16>
    %cst_23 = arith.constant dense<0.000000e+00> : vector<24x128xf32>
    %50 = tpu.matmul %48, %49, %cst_23 {dimension_numbers = #tpu.dot_dimension_numbers<[1], [0], [0], [1], [0, 0, 1, 1], [], []>} : vector<24x4xbf16>, vector<4x128xbf16>, vector<24x128xf32> -> vector<24x128xf32>
    %51 = arith.addf %43, %50 : vector<24x128xf32>
    %52 = vector.extract_strided_slice %2 {offsets = [0, 6], sizes = [4, 122], strides = [1, 1]} : vector<4x128xf32> to vector<4x122xf32>
    %53 = vector.extract_strided_slice %5 {offsets = [0, 0], sizes = [4, 6], strides = [1, 1]} : vector<4x128xf32> to vector<4x6xf32>
    %54 = tpu.concatenate %52, %53 in 1 : vector<4x122xf32>, vector<4x6xf32> -> vector<4x128xf32>
    %c6 = arith.constant 6 : index
    %c0_24 = arith.constant 0 : index
    %c0_25 = arith.constant 0 : index
    %55 = vector.load %arg4[%c6, %c0_24, %c0_25] : memref<9x24x4xbf16, #tpu.memory_space<vmem>>, vector<1x24x4xbf16>
    %56 = vector.shape_cast %55 : vector<1x24x4xbf16> to vector<24x4xbf16>
    %57 = arith.truncf %54 : vector<4x128xf32> to vector<4x128xbf16>
    %cst_26 = arith.constant dense<0.000000e+00> : vector<24x128xf32>
    %58 = tpu.matmul %56, %57, %cst_26 {dimension_numbers = #tpu.dot_dimension_numbers<[1], [0], [0], [1], [0, 0, 1, 1], [], []>} : vector<24x4xbf16>, vector<4x128xbf16>, vector<24x128xf32> -> vector<24x128xf32>
    %59 = arith.addf %51, %58 : vector<24x128xf32>
    %60 = vector.extract_strided_slice %2 {offsets = [0, 7], sizes = [4, 121], strides = [1, 1]} : vector<4x128xf32> to vector<4x121xf32>
    %61 = vector.extract_strided_slice %5 {offsets = [0, 0], sizes = [4, 7], strides = [1, 1]} : vector<4x128xf32> to vector<4x7xf32>
    %62 = tpu.concatenate %60, %61 in 1 : vector<4x121xf32>, vector<4x7xf32> -> vector<4x128xf32>
    %c7 = arith.constant 7 : index
    %c0_27 = arith.constant 0 : index
    %c0_28 = arith.constant 0 : index
    %63 = vector.load %arg4[%c7, %c0_27, %c0_28] : memref<9x24x4xbf16, #tpu.memory_space<vmem>>, vector<1x24x4xbf16>
    %64 = vector.shape_cast %63 : vector<1x24x4xbf16> to vector<24x4xbf16>
    %65 = arith.truncf %62 : vector<4x128xf32> to vector<4x128xbf16>
    %cst_29 = arith.constant dense<0.000000e+00> : vector<24x128xf32>
    %66 = tpu.matmul %64, %65, %cst_29 {dimension_numbers = #tpu.dot_dimension_numbers<[1], [0], [0], [1], [0, 0, 1, 1], [], []>} : vector<24x4xbf16>, vector<4x128xbf16>, vector<24x128xf32> -> vector<24x128xf32>
    %67 = arith.addf %59, %66 : vector<24x128xf32>
    %68 = vector.extract_strided_slice %2 {offsets = [0, 8], sizes = [4, 120], strides = [1, 1]} : vector<4x128xf32> to vector<4x120xf32>
    %69 = vector.extract_strided_slice %5 {offsets = [0, 0], sizes = [4, 8], strides = [1, 1]} : vector<4x128xf32> to vector<4x8xf32>
    %70 = tpu.concatenate %68, %69 in 1 : vector<4x120xf32>, vector<4x8xf32> -> vector<4x128xf32>
    %c8 = arith.constant 8 : index
    %c0_30 = arith.constant 0 : index
    %c0_31 = arith.constant 0 : index
    %71 = vector.load %arg4[%c8, %c0_30, %c0_31] : memref<9x24x4xbf16, #tpu.memory_space<vmem>>, vector<1x24x4xbf16>
    %72 = vector.shape_cast %71 : vector<1x24x4xbf16> to vector<24x4xbf16>
    %73 = arith.truncf %70 : vector<4x128xf32> to vector<4x128xbf16>
    %cst_32 = arith.constant dense<0.000000e+00> : vector<24x128xf32>
    %74 = tpu.matmul %72, %73, %cst_32 {dimension_numbers = #tpu.dot_dimension_numbers<[1], [0], [0], [1], [0, 0, 1, 1], [], []>} : vector<24x4xbf16>, vector<4x128xbf16>, vector<24x128xf32> -> vector<24x128xf32>
    %75 = arith.addf %67, %74 : vector<24x128xf32>
    %c0_33 = arith.constant 0 : index
    %c0_34 = arith.constant 0 : index
    %76 = vector.load %arg5[%c0_33, %c0_34] : memref<24x1xf32, #tpu.memory_space<vmem>>, vector<24x1xf32>
    %77 = vector.broadcast %76 : vector<24x1xf32> to vector<24x128xf32>
    %78 = arith.addf %75, %77 : vector<24x128xf32>
    %cst_35 = arith.constant 0.000000e+00 : f32
    %79 = vector.broadcast %cst_35 : f32 to vector<24x128xf32>
    %80 = arith.maximumf %78, %79 : vector<24x128xf32>
    %c0_36 = arith.constant 0 : index
    %c0_37 = arith.constant 0 : index
    %c0_38 = arith.constant 0 : index
    %81 = vector.load %arg6[%c0_36, %c0_37, %c0_38] : memref<1x24x128xf32, #tpu.memory_space<vmem>>, vector<1x24x128xf32>
    %82 = vector.shape_cast %81 : vector<1x24x128xf32> to vector<24x128xf32>
    %83 = vector.shape_cast %80 : vector<24x128xf32> to vector<1x24x128xf32>
    tpu.vector_store %arg6[%c0_36, %c0_37, %c0_38], %83 {strides = array<i32>} : memref<1x24x128xf32, #tpu.memory_space<vmem>>, vector<1x24x128xf32>,
    return
  }
  func.func @transform_0(%arg0: i32, %arg1: i32) -> (i32, i32, i32) {
    %c0_i32 = arith.constant 0 : i32
    %c0_i32_0 = arith.constant 0 : i32
    return %arg0, %c0_i32, %arg1 : i32, i32, i32
  }
  func.func @transform_1(%arg0: i32, %arg1: i32) -> (i32, i32, i32) {
    %c1_i32 = arith.constant 1 : i32
    %0 = arith.addi %arg1, %c1_i32 : i32
    %c1_i32_0 = arith.constant 1 : i32
    %1 = arith.muli %0, %c1_i32_0 : i32
    %c0_i32 = arith.constant 0 : i32
    %c0_i32_1 = arith.constant 0 : i32
    return %arg0, %c0_i32, %1 : i32, i32, i32
  }
  func.func @transform_2(%arg0: i32, %arg1: i32) -> (i32, i32, i32) {
    %c0_i32 = arith.constant 0 : i32
    %c0_i32_0 = arith.constant 0 : i32
    %c0_i32_1 = arith.constant 0 : i32
    %c0_i32_2 = arith.constant 0 : i32
    return %c0_i32, %c0_i32_0, %c0_i32_1 : i32, i32, i32
  }
  func.func @transform_3(%arg0: i32, %arg1: i32) -> (i32, i32) {
    %c0_i32 = arith.constant 0 : i32
    %c0_i32_0 = arith.constant 0 : i32
    %c0_i32_1 = arith.constant 0 : i32
    return %c0_i32, %c0_i32_0 : i32, i32
  }
  func.func @transform_4(%arg0: i32, %arg1: i32) -> (i32, i32, i32) {
    %c0_i32 = arith.constant 0 : i32
    %c0_i32_0 = arith.constant 0 : i32
    return %arg0, %c0_i32, %arg1 : i32, i32, i32
  }
}

</mosaic_0001>

<bundles_post_ra>
// kernel: multi_scale_conv_embedding.1
= control target key start
LH: loop header
LB: loop body
LE: loop exit
PB: predicated region body
PF: predicated region fallthrough
CT: control target
= control target key end

     0   :  { %s1435_s15 = smov 0   ;;  %s1437_s16 = smov 0   ;;  %s1574_s0 = inlined_call_operand.vmem [shape: bf16[2,4,256], index: 0, kind: input, shape index: {}, may-alias: {0,1}]   ;;  %s1575_s1 = inlined_call_operand.vmem [shape: bf16[2,4,256], index: 1, kind: input, shape index: {}, may-alias: {0,1}]   ;;  %s1576_s2 = inlined_call_operand.vmem [shape: bf16[9,24,4], index: 2, kind: input, shape index: {}]   ;;  %s1577_s3 = inlined_call_operand.vmem [shape: f32[24,1], index: 3, kind: input, shape index: {}]   ;;  %s1578_s4 = inlined_call_operand.vmem [shape: f32[2,24,128], index: 4, kind: output, shape index: {}]  }
   0x1   :  { %s1439_s17 = smov 0  }
   0x2 LB: > { %s26_s18 = sadd.s32 1, %s1395_s16  ;;  %p1121_p0 = scmp.ge.s32.totalorder %s1399_s17, 1  ;;  %s1399_s17 = sphi %s1439_s17, %s14_s17   ;;  %s1395_s16 = sphi %s1437_s16, %s1580_s16   ;;  %s1391_s15 = sphi %s1435_s15, %s1579_s15  }
   0x3   : > { %p28_p1 = scmp.ge.s32.totalorder %s26_s18, 2  ;;  %p200_p2 = scmp.lt.s32.totalorder %s1399_s17, 3 }
   0x5   : > { %s1582_s18 = smov (%p28_p1, %s26_s18), 0  ;;  %p201_p3 = pnand %p1121_p0, %p200_p2 }
   0x6   : > { %p241_p4 = scmp.lt.s32.totalorder (!%p201_p3), %s1391_s15, 1  ;;  %vm305_vm0 = vcmask (!%p201_p3), 1041408   ;;  %v1359_v0 = vld [vmem:[%s1576_s2 + $0xc] sm:$0xff] (!%p201_p3)   ;;  %v1360_v1 = vld [vmem:[%s1576_s2] sm:$0xff] (!%p201_p3)   ;;  %vm298_vm1 = vcmask (!%p201_p3), 31744   ;;  %s1401_s7 = smov (!%p201_p3), 127  }
   0x7   : > { %204 = sbr.rel (%p201_p3) target bundleno = 401 (0x191), region = 36  ;;  %1222 = vmatprep.mubr.msk.bf16.mxu0 (!%p201_p3), %vm298_vm1, %v1359_v0  ;;  %1228 = vmatprep.mubr.msk.bf16.mxu1 (!%p201_p3), %vm298_vm1, %v1360_v1  ;;  %v1362_v7 = vld [vmem:[%s1576_s2 + $0x8] ss:$0 sps:$4 sm:$0xff] (!%p201_p3)   ;;  %s1402_s8 = smov (!%p201_p3), 125   ;;  %v989_v11 = vld [vmem:[%s1577_s3] sm:$0xff] (!%p201_p3)  ;;  %v1409_v12 = vmov (!%p201_p3), 0  }
   0x8   : > { %v1365_v9 = vld [vmem:[%s1576_s2 + $0x24] sm:$0xff] (!%p201_p3)   ;;  %s1403_s11 = smov (!%p201_p3), 126   ;;  %s1404_s12 = smov (!%p201_p3), 124   ;;  %1358 = vset.pattern.permute.xlu1 (!%p201_p3), %v1409_v12  ;;  %1357 = vset.pattern.permute.xlu0 (!%p201_p3), %v1409_v12  ;;  %v991_v13 = vld [vmem:[%s1577_s3 + $0x10] sm:$0xff] (!%p201_p3)  ;;  %vm283_vm2 = vcmask (!%p201_p3), 1039360   ;;  %vm509_vm3 = vcmask (!%p201_p3), 1022976  }
   0x9   : > { %s1405_s13 = smov (!%p201_p3), 123   ;;  %s1406_s14 = smov (!%p201_p3), 122   ;;  %v990_v10 = vld [vmem:[%s1577_s3 + $0x8] sm:$0xff] (!%p201_p3)  ;;  %vm428_vm4 = vcmask (!%p201_p3), 1031168   ;;  %vm590_vm5 = vcmask (!%p201_p3), 1014784   ;;  %v1363_v35 = vld [vmem:[%s1576_s2 + $0x18] sm:$0xff] (!%p201_p3)  }
   0xa   : > { %s1408_s20 = smov (!%p201_p3), 120   ;;  %v1361_v31 = vld [vmem:[%s1576_s2 + $0x14] ss:$0 sps:$4 sm:$0xff] (!%p201_p3)   ;;  %vm671_vm6 = vcmask (!%p201_p3), 1006592   ;;  %v1366_v40 = vld [vmem:[%s1576_s2 + $0x2c] ss:$0 sps:$4 sm:$0xff] (!%p201_p3)  }
   0xb   : > { %v1369_v45 = vld [vmem:[%s1576_s2 + $0x3c] sm:$0xff] (!%p201_p3)   ;;  %vm752_vm7 = vcmask (!%p201_p3), 998400   ;;  %vm833_vm8 = vcmask (!%p201_p3), 990208   ;;  %v1367_v56 = vld [vmem:[%s1576_s2 + $0x30] sm:$0xff] (!%p201_p3)   ;;  %v1370_v61 = vld [vmem:[%s1576_s2 + $0x44] ss:$0 sps:$4 sm:$0xff] (!%p201_p3)  }
   0xc   : > { %v1364_v53 = vld [vmem:[%s1576_s2 + $0x20] ss:$0 sps:$4 sm:$0xff] (!%p201_p3)   ;;  %v1373_v0 = vld [vmem:[%s1576_s2 + $0x54] sm:$0xff] (!%p201_p3)   ;;  %vm914_vm9 = vcmask (!%p201_p3), 982016  }
   0xe   : > { %s1584_s15 = smov (!%p241_p4, %s1391_s15), 1 }
   0xf   : > { %s1189_s19 = sshll.u32 %s1584_s15, 2 }
  0x10   : > { %s248_s22 = scalar_lea.vmem %s1574_s0, %s1189_s19  ;;  %s1191_s23 = sadd.s32 2, %s1189_s19 }
  0x11   : > { %s257_s30 = scalar_lea.vmem %s1575_s1, %s1191_s23  ;;  %v268_v2 = vld [vmem:[%s248_s22] sm:$0x3]  ;;  %s1407_s19 = smov 121  }
  0x12   : > { %v269_v3 = vunpack.c.l.bf16 %v268_v2  ;;  %v270_v4 = vld [vmem:[%s257_s30] sm:$0x3]  ;;  %1275 = vmatprep.subr.msk.bf16.mxu1 %vm305_vm0, %v268_v2  ;;  %v372_v5 = vsel %vm305_vm0, %v268_v2, 0 }
  0x13   : > { %v271_v6 = vunpack.c.l.bf16 %v270_v4  ;;  %1227 = vmatpush3.bf16.msra.mxu1 %v372_v5  ;;  %v1371_v4 = vld [vmem:[%s1576_s2 + $0x48] sm:$0xff]  }
  0x15   : > { %v1317_v8 = vpack.i.bf16 %v271_v6, %v269_v3  ;;  %v1368_v3 = vld [vmem:[%s1576_s2 + $0x38] ss:$0 sps:$4 sm:$0xff]  }
  0x16   : > { %1229 = vmatmul.mubr.msk.bf16.vlgmr.msra.gmra.mrb[0].mxu1 %vm298_vm1, %v1362_v7  ;;  %v1374_v7 = vld [vmem:[%s1576_s2 + $0x5c] ss:$0 sps:$4 sm:$0xff]  }
  0x17   : > { %1318 = vrot.lane.b32.xlu0 %v1317_v8, %s1401_s7  ;;  %1328 = vrot.lane.b32.xlu1 %v1317_v8, %s1402_s8  ;;  %s1283_s7 = smul.u32 24, %s1584_s15 }
  0x18   : > { %1240 = vmatprep.mubr.msk.bf16.mxu1 %vm298_vm1, %v1365_v9  ;;  %v1375_v9 = vld [vmem:[%s1576_s2 + $0x60] sm:$0xff]  }
  0x19   : > { %s266_s10 = scalar_lea.vmem %s1578_s4, %s1283_s7 }
  0x1b   : > { %1323 = vrot.lane.b32.xlu0 %v1317_v8, %s1403_s11  ;;  %1333 = vrot.lane.b32.xlu1 %v1317_v8, %s1404_s12 }
  0x1f   : > { %1338 = vrot.lane.b32.xlu0 %v1317_v8, %s1405_s13  ;;  %1343 = vrot.lane.b32.xlu1 %v1317_v8, %s1406_s14 }
  0x23   : > { %1348 = vrot.lane.b32.xlu0 %v1317_v8, %s1407_s19  ;;  %1353 = vrot.lane.b32.xlu1 %v1317_v8, %s1408_s20  ;;  %v1372_v8 = vld [vmem:[%s1576_s2 + $0x50] ss:$0 sps:$4 sm:$0xff]  }
  0x27   : > { %999 = vperm.xlu1 %1358, %v990_v10   ;;  %994 = vperm.xlu0 %1357, %v989_v11   ;;  %v1376_v11 = vld [vmem:[%s1576_s2 + $0x68] ss:$0 sps:$4 sm:$0xff]  }
  0x2b   : > { %1004 = vperm.xlu1 %1358, %v991_v13  }
  0x89   : > { %v1319_v14 = vpop.permute.xlu0 %1318  ;;  %v1329_v15 = vpop.permute.xlu1 %1328 }
  0x8a   : > { %v1321_v16 = vunpack.i.h.bf16 %v1319_v14  ;;  %v1320_v17 = vunpack.i.l.bf16 %v1319_v14  ;;  %v1331_v18 = vunpack.i.h.bf16 %v1329_v15  ;;  %v1330_v19 = vunpack.i.l.bf16 %v1329_v15 }
  0x8c   : > { %v284_v20 = vsel %vm283_vm2, %v1320_v17, %v1321_v16  ;;  %v510_v21 = vsel %vm509_vm3, %v1330_v19, %v1331_v18 }
  0x8d   : > { %v1324_v22 = vpop.permute.xlu0 %1323  ;;  %v289_v23 = vpack.c.bf16 %v284_v20, %v284_v20  ;;  %v515_v24 = vpack.c.bf16 %v510_v21, %v510_v21  ;;  %v1334_v25 = vpop.permute.xlu1 %1333 }
  0x8e   : > { %v1326_v26 = vunpack.i.h.bf16 %v1324_v22  ;;  %v1325_v27 = vunpack.i.l.bf16 %v1324_v22  ;;  %v1336_v28 = vunpack.i.h.bf16 %v1334_v25  ;;  %v1335_v29 = vunpack.i.l.bf16 %v1334_v25 }
  0x8f   : > { %1274 = vmatprep.subr.msk.bf16.mxu0 %vm305_vm0, %v289_v23  ;;  %v307_v30 = vsel %vm305_vm0, %v289_v23, 0  ;;  %1277 = vmatprep.subr.msk.bf16.mxu1 %vm305_vm0, %v515_v24  ;;  %v531_v32 = vsel %vm305_vm0, %v515_v24, 0 }
  0x90   : > { %v429_v33 = vsel %vm428_vm4, %v1325_v27, %v1326_v26  ;;  %1221 = vmatpush3.bf16.msra.mxu0 %v307_v30  ;;  %v591_v34 = vsel %vm590_vm5, %v1335_v29, %v1336_v28  ;;  %1239 = vmatpush3.bf16.msra.mxu1 %v531_v32 }
  0x91   : > { %v434_v36 = vpack.c.bf16 %v429_v33, %v429_v33  ;;  %v596_v37 = vpack.c.bf16 %v591_v34, %v591_v34  ;;  %v1339_v38 = vpop.permute.xlu0 %1338  ;;  %v1344_v39 = vpop.permute.xlu1 %1343 }
  0x92   : > { %v1341_v41 = vunpack.i.h.bf16 %v1339_v38  ;;  %v1340_v42 = vunpack.i.l.bf16 %v1339_v38  ;;  %v1346_v43 = vunpack.i.h.bf16 %v1344_v39  ;;  %v1345_v44 = vunpack.i.l.bf16 %v1344_v39 }
  0x93   : > { %1223 = vmatmul.mubr.msk.bf16.vlgmr.msra.gmra.mrb[0].mxu0 %vm298_vm1, %v1361_v31  ;;  %1276 = vmatprep.subr.msk.bf16.mxu0 %vm305_vm0, %v434_v36  ;;  %v450_v46 = vsel %vm305_vm0, %v434_v36, 0  ;;  %v612_v58 = vsel %vm305_vm0, %v596_v37, 0 }
  0x94   : > { %1233 = vmatpush3.bf16.msra.mxu0 %v450_v46  ;;  %1234 = vmatprep.mubr.msk.bf16.mxu0 %vm298_vm1, %v1363_v35  ;;  %v672_v47 = vsel %vm671_vm6, %v1340_v42, %v1341_v41  ;;  %v753_v50 = vsel %vm752_vm7, %v1345_v44, %v1346_v43 }
  0x95   : > { %v677_v48 = vpack.c.bf16 %v672_v47, %v672_v47  ;;  %1278 = vmatprep.subr.msk.bf16.mxu0 %vm305_vm0, %v596_v37  ;;  %1241 = vmatmul.mubr.msk.bf16.vlgmr.msra.gmra.mrb[4].mxu1 %vm298_vm1, %v1366_v40  ;;  %v1349_v49 = vpop.permute.xlu0 %1348  ;;  %v1354_v55 = vpop.permute.xlu1 %1353  ;;  %v758_v59 = vpack.c.bf16 %v753_v50, %v753_v50 }
  0x96   : > { %v1351_v51 = vunpack.i.h.bf16 %v1349_v49  ;;  %v1350_v52 = vunpack.i.l.bf16 %v1349_v49  ;;  %1252 = vmatprep.mubr.msk.bf16.mxu1 %vm298_vm1, %v1369_v45  ;;  %v1356_v62 = vunpack.i.h.bf16 %v1354_v55  ;;  %v1355_v63 = vunpack.i.l.bf16 %v1354_v55 }
  0x97   : > { %1279 = vmatprep.subr.msk.bf16.mxu1 %vm305_vm0, %v677_v48  ;;  %v693_v54 = vsel %vm305_vm0, %v677_v48, 0  ;;  %v774_v5 = vsel %vm305_vm0, %v758_v59, 0 }
  0x98   : > { %1251 = vmatpush3.bf16.msra.mxu1 %v693_v54  ;;  %v834_v57 = vsel %vm833_vm8, %v1350_v52, %v1351_v51  ;;  %v915_v2 = vsel %vm914_vm9, %v1355_v63, %v1356_v62 }
  0x99   : > { %v839_v60 = vpack.c.bf16 %v834_v57, %v834_v57  ;;  %v920_v6 = vpack.c.bf16 %v915_v2, %v915_v2 }
  0x9b   : > { %1235 = vmatmul.mubr.msk.bf16.vlgmr.msra.gmra.mrb[4].mxu0 %vm298_vm1, %v1364_v53  ;;  %1281 = vmatprep.subr.msk.bf16.mxu1 %vm305_vm0, %v839_v60  ;;  %v855_v1 = vsel %vm305_vm0, %v839_v60, 0  ;;  %v936_v10 = vsel %vm305_vm0, %v920_v6, 0 }
  0x9c   : > { %1245 = vmatpush3.bf16.msra.mxu0 %v612_v58  ;;  %1246 = vmatprep.mubr.msk.bf16.mxu0 %vm298_vm1, %v1367_v56 }
  0x9d   : > { %1280 = vmatprep.subr.msk.bf16.mxu0 %vm305_vm0, %v758_v59  ;;  %1253 = vmatmul.mubr.msk.bf16.vlgmr.msra.gmra.mrb[8].mxu1 %vm298_vm1, %v1370_v61 }
  0x9e   : > { %1263 = vmatpush3.bf16.msra.mxu1 %v855_v1  ;;  %1264 = vmatprep.mubr.msk.bf16.mxu1 %vm298_vm1, %v1373_v0 }
  0xa3   : > { %1247 = vmatmul.mubr.msk.bf16.vlgmr.msra.gmra.mrb[8].mxu0 %vm298_vm1, %v1368_v3 }
  0xa4   : > { %1257 = vmatpush3.bf16.msra.mxu0 %v774_v5  ;;  %1258 = vmatprep.mubr.msk.bf16.mxu0 %vm298_vm1, %v1371_v4 }
  0xa5   : > { %1282 = vmatprep.subr.msk.bf16.mxu0 %vm305_vm0, %v920_v6  ;;  %1265 = vmatmul.mubr.msk.bf16.vlgmr.msra.gmra.mrb[12].mxu1 %vm298_vm1, %v1374_v7 }
  0xa6   : > { %v1000_v60 = vpop.permute.xlu1 %999  ;;  %v995_v6 = vpop.permute.xlu0 %994 }
  0xaa   : > { %v1005_v3 = vpop.permute.xlu1 %1004 }
  0xab   : > { %1259 = vmatmul.mubr.msk.bf16.vlgmr.msra.gmra.mrb[12].mxu0 %vm298_vm1, %v1372_v8 }
  0xac   : > { %1269 = vmatpush3.bf16.msra.mxu0 %v936_v10  ;;  %1270 = vmatprep.mubr.msk.bf16.mxu0 %vm298_vm1, %v1375_v9 }
  0xb3   : > { %1271 = vmatmul.mubr.msk.bf16.vlgmr.msra.gmra.mrb[16].mxu0 %vm298_vm1, %v1376_v11 }
  0xe9   : > { %v1230_v12 = vpop.f32.mrb[0].mxu1 }
  0xea   : > { %v408_v13 = vpop.f32.mrb[1].mxu1 }
  0xeb   : > { %v1231_v14 = vpop.f32.mrb[2].mxu1 }
  0xec   : > { %v411_v15 = vpop.f32.mrb[3].mxu1 }
 0x166   : > { %v1224_v16 = vpop.f32.mrb[0].mxu0 }
 0x167   : > { %v417_v17 = vadd.f32 %v1230_v12, %v1224_v16  ;;  %v343_v18 = vpop.f32.mrb[1].mxu0 }
 0x168   : > { %v409_v19 = vadd.f32 %v408_v13, %v343_v18  ;;  %v1225_v20 = vpop.f32.mrb[2].mxu0  ;;  %v1242_v21 = vpop.f32.mrb[4].mxu1 }
 0x169   : > { %v346_v22 = vpop.f32.mrb[3].mxu0  ;;  %v567_v23 = vpop.f32.mrb[5].mxu1 }
 0x16a   : > { %v412_v24 = vadd.f32 %v411_v15, %v346_v22  ;;  %v1243_v25 = vpop.f32.mrb[6].mxu1 }
 0x16b   : > { %v570_v26 = vpop.f32.mrb[7].mxu1 }
 0x16e   : > { %v1236_v27 = vpop.f32.mrb[4].mxu0 }
 0x16f   : > { %v502_v28 = vadd.f32 %v1236_v27, %v417_v17  ;;  %v486_v29 = vpop.f32.mrb[5].mxu0 }
 0x170   : > { %v500_v30 = vadd.f32 %v486_v29, %v409_v19  ;;  %v1237_v31 = vpop.f32.mrb[6].mxu0  ;;  %v1254_v32 = vpop.f32.mrb[8].mxu1 }
 0x171   : > { %v583_v33 = vadd.f32 %v1242_v21, %v502_v28  ;;  %v489_v34 = vpop.f32.mrb[7].mxu0  ;;  %v729_v35 = vpop.f32.mrb[9].mxu1 }
 0x172   : > { %v501_v36 = vadd.f32 %v489_v34, %v412_v24  ;;  %v581_v37 = vadd.f32 %v567_v23, %v500_v30  ;;  %v1255_v38 = vpop.f32.mrb[10].mxu1 }
 0x173   : > { %v732_v39 = vpop.f32.mrb[11].mxu1 }
 0x174   : > { %v582_v40 = vadd.f32 %v570_v26, %v501_v36 }
 0x176   : > { %v1248_v41 = vpop.f32.mrb[8].mxu0 }
 0x177   : > { %v664_v42 = vadd.f32 %v1248_v41, %v583_v33  ;;  %v648_v43 = vpop.f32.mrb[9].mxu0 }
 0x178   : > { %v662_v44 = vadd.f32 %v648_v43, %v581_v37  ;;  %v1249_v45 = vpop.f32.mrb[10].mxu0  ;;  %v1266_v46 = vpop.f32.mrb[12].mxu1 }
 0x179   : > { %v745_v47 = vadd.f32 %v1254_v32, %v664_v42  ;;  %v651_v48 = vpop.f32.mrb[11].mxu0  ;;  %v891_v49 = vpop.f32.mrb[13].mxu1 }
 0x17a   : > { %v663_v50 = vadd.f32 %v651_v48, %v582_v40  ;;  %v743_v51 = vadd.f32 %v729_v35, %v662_v44  ;;  %v1267_v52 = vpop.f32.mrb[14].mxu1 }
 0x17b   : > { %v894_v53 = vpop.f32.mrb[15].mxu1 }
 0x17c   : > { %v744_v54 = vadd.f32 %v732_v39, %v663_v50 }
 0x17e   : > { %v1260_v55 = vpop.f32.mrb[12].mxu0 }
 0x17f   : > { %v826_v56 = vadd.f32 %v1260_v55, %v745_v47  ;;  %v810_v57 = vpop.f32.mrb[13].mxu0 }
 0x180   : > { %v824_v58 = vadd.f32 %v810_v57, %v743_v51  ;;  %v1261_v59 = vpop.f32.mrb[14].mxu0 }
 0x181   : > { %v907_v61 = vadd.f32 %v1266_v46, %v826_v56  ;;  %v813_v62 = vpop.f32.mrb[15].mxu0 }
 0x182   : > { %v825_v63 = vadd.f32 %v813_v62, %v744_v54  ;;  %v905_v0 = vadd.f32 %v891_v49, %v824_v58 }
 0x184   : > { %v906_v1 = vadd.f32 %v894_v53, %v825_v63 }
 0x186   : > { %v1272_v2 = vpop.f32.mrb[16].mxu0 }
 0x187   : > { %v988_v4 = vadd.f32 %v1272_v2, %v907_v61  ;;  %v972_v5 = vpop.f32.mrb[17].mxu0 }
 0x188   : > { %v986_v7 = vadd.f32 %v972_v5, %v905_v0  ;;  %v1273_v8 = vpop.f32.mrb[18].mxu0 }
 0x189   : > { %v1009_v9 = vadd.f32 %v1005_v3, %v988_v4  ;;  %v975_v10 = vpop.f32.mrb[19].mxu0 }
 0x18a   : > { %v1007_v11 = vadd.f32 %v995_v6, %v986_v7  ;;  %v987_v12 = vadd.f32 %v975_v10, %v906_v1 }
 0x18b   : > { %v1012_v13 = vmax.f32 %v1009_v9, 0.0 }
 0x18c   : > { %v1010_v14 = vmax.f32 %v1007_v11, 0.0  ;;  %v1008_v15 = vadd.f32 %v1000_v60, %v987_v12 }
 0x18d   : > { %1015 = vst [vmem:[%s266_s10 + $0x10] sm:$0xff] %v1012_v13 }
 0x18e   : > { %1013 = vst [vmem:[%s266_s10] sm:$0xff] %v1010_v14  ;;  %v1011_v16 = vmax.f32 %v1008_v15, 0.0 }
 0x190   : > { %1014 = vst [vmem:[%s266_s10 + $0x8] sm:$0xff] %v1011_v16 }
 0x191 PF: > { %s14_s17 = sadd.s32 1, %s1399_s17   ;;  %s1579_s15 = smov %s1395_s16 }
 0x192   : > { %p11_p5 = scmp.ge.s32.totalorder %s14_s17, 4   ;;  %s1580_s16 = smov %s1582_s18 }
 0x194   :  { %13 = sbr.rel (!%p11_p5) target bundleno = 2 (0x2), region = 77 }

</bundles_post_ra>
